<compile_context>
chip_gen: v5e
topology: v5e:2x2
jax: 0.10.0
libtpu: 0.0.40
codegen_flags: <defaults>
</compile_context>

<pallas_src>
import functools

import jax
import jax.numpy as jnp
from jax import lax
from jax.experimental import pallas as pl
from jax.experimental.pallas import tpu as pltpu


# ----------------------------------------------------------------------------
# VMEM planning
# ----------------------------------------------------------------------------
def _vmem_plan():
    """Generation-aware (slab_budget_bytes, vmem_limit_bytes)."""
    cap = None
    try:
        cap = getattr(pltpu.get_tpu_info(), "vmem_capacity_bytes", None)
    except Exception:
        cap = None
    if not cap:
        cap = 64 << 20  # conservative default = v7x-sized VMEM; safe everywhere
    if cap >= (96 << 20):
        # v5e / v6e: 128 MiB physical VMEM -> use most of it for the pipeline.
        budget = int(cap * 0.60)
    else:
        # v7x: 64 MiB per TensorCore -> leave headroom for Mosaic scratch.
        budget = int(cap * 0.42)
    limit = int(cap * 0.85)
    return budget, limit


def _plan_tiling(B, T, H, in_isz, out_isz, budget, *, force_seq=False):
    """Pick ("batch", bb, None) or ("seq", bb, tt) so blocks fit `budget`."""
    # bf16 packs 16 rows per sublane-packed vreg -> align batch blocks to 16;
    # f32 -> 8. Keeps (bb,H)/(bb,T) output stores unmasked.
    row_align = 16 if in_isz < 4 else 8
    # Per batch row: double-buffered (T,H) input block + one f32 (T,H)
    # fused-elementwise temporary + double-buffered (T)+(H) output rows.
    per_row = 2 * T * H * in_isz + T * H * 4 + 2 * (T + H) * out_isz + 64
    bb_fit = budget // per_row
    min_bb = min(B, row_align)

    if force_seq or bb_fit < min_bb:
        # Even a minimal aligned batch block over-commits VMEM (large T*H):
        # tile the sequence axis with an online softmax instead of inflating
        # the batch block past the budget.
        bb = min_bb
        const = bb * H * (4 + 2 * out_isz) + 2 * H * 4 + 4096   # acc + ctx out + w
        per_t = bb * (H * (2 * in_isz + 4) + 3 * 4) + 16        # x dbl-buf + f32 tmp + scores
        tt_fit = max(1, (budget - const) // per_t)
        if T <= 128 or tt_fit >= T:
            tt = T
        else:
            # (bb, tt) score blocks: last dim must be a multiple of 128 (or T).
            tt = min(max(128, (tt_fit // 128) * 128), T)
        return "seq", int(bb), int(tt)

    bb = min(bb_fit, B)
    if B >= 2 * row_align:
        # Guarantee >= 2 grid steps so the "parallel" batch axis can shard
        # across both v7x TensorCores; neutral on single-TC v5e/v6e.
        bb = min(bb, B // 2)
    if bb < B:
        bb = max(row_align, (bb // row_align) * row_align)
        bb = min(bb, B)
    return "batch", int(bb), None


# ----------------------------------------------------------------------------
# Path A: batch-blocked, whole sequence resident per step
# ----------------------------------------------------------------------------
def _attention_batch_kernel(x_ref, w_ref, b_ref, ctx_ref, wts_ref):
    # x_ref:   (bb, T, H) VMEM block of lstm_out (kept in its native dtype;
    #          each multiply promotes to f32 so the cast fuses per-vreg and we
    #          never hold a persistent f32 copy of the block).
    # w_ref:   (1, H) f32 shared attention weight (nn.Linear(H, 1).weight)
    # b_ref:   (1,)  f32 scalar bias in SMEM
    # ctx_ref: (bb, H) context output; wts_ref: (bb, T) attention weights.
    x = x_ref[...]
    w = w_ref[...]

    # scores[b, t] = sum_h x[b, t, h] * w[h] + bias   (VPU mul + XLU reduce;
    # avoids a >99%-padded N=1 MXU mat-vec and an in-kernel weight transpose).
    scores = jnp.sum(x * w[None, :, :], axis=-1) + b_ref[0]       # (bb, T) f32

    # Numerically stable softmax along the sequence (lane) axis == torch dim=1.
    m = jnp.max(scores, axis=-1, keepdims=True)
    e = jnp.exp(scores - m)
    denom = jnp.sum(e, axis=-1, keepdims=True)
    r = pl.reciprocal(denom, approx=True)          # EUP vrcp (free slot)
    r = r * (2.0 - denom * r)                      # 1 Newton step -> f32 accuracy
    weights = e * r                                # (bb, T) f32

    # Lane-dense store in the natural layout (bf16 inputs -> bf16 weights,
    # matching the PyTorch module's dtype behaviour).
    wts_ref[...] = weights.astype(wts_ref.dtype)

    # context[b, h] = sum_t x[b, t, h] * weights[b, t] (promotes to f32).
    ctx_ref[...] = jnp.sum(x * weights[:, :, None], axis=1).astype(ctx_ref.dtype)


def _attention_batch_blocked(lstm_out, w32, b32, *, bb, limit):
    B, T, H = lstm_out.shape
    return pl.pallas_call(
        _attention_batch_kernel,
        out_shape=(
            jax.ShapeDtypeStruct((B, H), lstm_out.dtype),
            jax.ShapeDtypeStruct((B, T), lstm_out.dtype),
        ),
        grid_spec=pltpu.PrefetchScalarGridSpec(
            num_scalar_prefetch=0,
            grid=(pl.cdiv(B, bb),),
            in_specs=[
                pl.BlockSpec((bb, T, H), lambda b: (b, 0, 0)),      # lstm_out slab
                pl.BlockSpec((1, H), lambda b: (0, 0)),             # weight (shared)
                pl.BlockSpec(memory_space=pltpu.MemorySpace.SMEM),  # bias scalar
            ],
            out_specs=[
                pl.BlockSpec((bb, H), lambda b: (b, 0)),            # context
                pl.BlockSpec((bb, T), lambda b: (b, 0)),            # weights
            ],
        ),
        compiler_params=pltpu.CompilerParams(
            dimension_semantics=("parallel",),
            vmem_limit_bytes=limit,
        ),
    )(lstm_out, w32, b32)


# ----------------------------------------------------------------------------
# Path B: sequence-tiled online softmax (for large T*H per row)
# ----------------------------------------------------------------------------
def _attention_seq_kernel(x_ref, w_ref, b_ref, ctx_ref, s_ref, lse_ref,
                          m_sc, l_sc, acc_sc, *, t_total, needs_mask):
    t = pl.program_id(1)

    @pl.when(t == 0)
    def _():
        m_sc[...] = jnp.full(m_sc.shape, -jnp.inf, m_sc.dtype)
        l_sc[...] = jnp.zeros(l_sc.shape, l_sc.dtype)
        acc_sc[...] = jnp.zeros(acc_sc.shape, acc_sc.dtype)

    x = x_ref[...]                                   # (bb, tt, H) native dtype
    w = w_ref[...]                                   # (1, H) f32
    tt = x_ref.shape[1]

    if needs_mask:
        # Partial last T-block: zero padded columns so garbage VMEM can't leak
        # into the max / denominator / context accumulator.
        col = lax.broadcasted_iota(jnp.int32, (1, tt, 1), 1) + t * tt
        valid = col < t_total                        # (1, tt, 1)
        x = jnp.where(valid, x, jnp.zeros_like(x))

    s = jnp.sum(x * w[None, :, :], axis=-1) + b_ref[0]   # (bb, tt) f32
    if needs_mask:
        s = jnp.where(valid[:, :, 0], s, -jnp.inf)
    s_ref[...] = s                                   # raw scores; normalized later

    m_prev = m_sc[...]
    m_new = jnp.maximum(m_prev, jnp.max(s, axis=-1, keepdims=True))
    alpha = jnp.exp(m_prev - m_new)                  # rescale of running sums
    p = jnp.exp(s - m_new)                           # (bb, tt) f32
    l_sc[...] = alpha * l_sc[...] + jnp.sum(p, axis=-1, keepdims=True)
    acc_sc[...] = alpha * acc_sc[...] + jnp.sum(x * p[:, :, None], axis=1)
    m_sc[...] = m_new

    @pl.when(t == pl.num_programs(1) - 1)
    def _():
        l = l_sc[...]
        r = pl.reciprocal(l, approx=True)
        r = r * (2.0 - l * r)                        # Newton step -> f32 accuracy
        ctx_ref[...] = (acc_sc[...] * r).astype(ctx_ref.dtype)
        lse_ref[...] = m_sc[...] + jnp.log(l)


def _softmax_finalize_kernel(s_ref, lse_ref, wts_ref):
    # weights = exp(scores - logsumexp); tiny (B, T) elementwise pass.
    wts_ref[...] = jnp.exp(s_ref[...] - lse_ref[...]).astype(wts_ref.dtype)


def _attention_seq_tiled(lstm_out, w32, b32, *, bb, tt, budget, limit):
    B, T, H = lstm_out.shape
    out_isz = jnp.dtype(lstm_out.dtype).itemsize
    needs_mask = (T % tt) != 0
    kern = functools.partial(_attention_seq_kernel, t_total=T, needs_mask=needs_mask)

    ctx, scores, lse = pl.pallas_call(
        kern,
        out_shape=(
            jax.ShapeDtypeStruct((B, H), lstm_out.dtype),
            jax.ShapeDtypeStruct((B, T), jnp.float32),   # raw scores (f32)
            jax.ShapeDtypeStruct((B, 1), jnp.float32),   # logsumexp per row
        ),
        grid_spec=pltpu.PrefetchScalarGridSpec(
            num_scalar_prefetch=0,
            grid=(pl.cdiv(B, bb), pl.cdiv(T, tt)),       # T axis last / innermost
            in_specs=[
                pl.BlockSpec((bb, tt, H), lambda b, t: (b, t, 0)),
                pl.BlockSpec((1, H), lambda b, t: (0, 0)),
                pl.BlockSpec(memory_space=pltpu.MemorySpace.SMEM),
            ],
            out_specs=[
                pl.BlockSpec((bb, H), lambda b, t: (b, 0)),    # resident across t
                pl.BlockSpec((bb, tt), lambda b, t: (b, t)),
                pl.BlockSpec((bb, 1), lambda b, t: (b, 0)),    # resident across t
            ],
            scratch_shapes=[
                pltpu.VMEM((bb, 1), jnp.float32),   # running max
                pltpu.VMEM((bb, 1), jnp.float32),   # running denominator
                pltpu.VMEM((bb, H), jnp.float32),   # context accumulator
            ],
        ),
        compiler_params=pltpu.CompilerParams(
            dimension_semantics=("parallel", "arbitrary"),
            vmem_limit_bytes=limit,
        ),
    )(lstm_out, w32, b32)

    # Tiny second pass over the (B, T) scores to emit normalized weights.
    per_row = 2 * T * 4 + 2 * T * out_isz + 16
    bbf = min(B, max(1, budget // per_row))
    if bbf < B:
        bbf = min(B, max(8, (bbf // 8) * 8))
    wts = pl.pallas_call(
        _softmax_finalize_kernel,
        out_shape=jax.ShapeDtypeStruct((B, T), lstm_out.dtype),
        grid_spec=pltpu.PrefetchScalarGridSpec(
            num_scalar_prefetch=0,
            grid=(pl.cdiv(B, bbf),),
            in_specs=[
                pl.BlockSpec((bbf, T), lambda i: (i, 0)),
                pl.BlockSpec((bbf, 1), lambda i: (i, 0)),
            ],
            out_specs=pl.BlockSpec((bbf, T), lambda i: (i, 0)),
        ),
        compiler_params=pltpu.CompilerParams(
            dimension_semantics=("parallel",),
            vmem_limit_bytes=limit,
        ),
    )(scores, lse)
    return ctx, wts


# ----------------------------------------------------------------------------
# Public wrapper
# ----------------------------------------------------------------------------
def attention_forward(lstm_out, attn_w, attn_b, *, slab_budget_bytes=None,
                      vmem_limit_bytes=None, force_seq_tiling=False):
    """lstm_out: (B, T, H); attn_w: (1, H); attn_b: (1,).

    Returns (context (B, H), weights (B, T)) matching the PyTorch module.
    """
    B, T, H = lstm_out.shape
    in_isz = jnp.dtype(lstm_out.dtype).itemsize
    out_isz = in_isz
    auto_budget, auto_limit = _vmem_plan()
    budget = slab_budget_bytes if slab_budget_bytes is not None else auto_budget
    limit = vmem_limit_bytes if vmem_limit_bytes is not None else auto_limit

    mode, bb, tt = _plan_tiling(B, T, H, in_isz, out_isz, budget,
                                force_seq=force_seq_tiling)
    w32 = attn_w.astype(jnp.float32)
    b32 = attn_b.reshape(1).astype(jnp.float32)

    if mode == "seq":
        return _attention_seq_tiled(lstm_out, w32, b32, bb=bb, tt=tt,
                                    budget=budget, limit=limit)
    return _attention_batch_blocked(lstm_out, w32, b32, bb=bb, limit=limit)


def _reference(lstm_out, attn_w, attn_b):
    scores = jnp.einsum("bth,oh->bto", lstm_out, attn_w)[..., 0] + attn_b[0]
    weights = jax.nn.softmax(scores, axis=1)
    context = jnp.sum(lstm_out * weights[..., None], axis=1)
    return context, weights


if __name__ == "__main__":
    key = jax.random.PRNGKey(0)
    k_x, k_w, k_b, k_x2 = jax.random.split(key, 4)

    # Deterministic init mimicking nn.Linear(hidden_size, 1) parameter shapes.
    H = 32
    bound = 1.0 / (H ** 0.5)
    attn_w = jax.random.uniform(k_w, (1, H), jnp.float32, -bound, bound)
    attn_b = jax.random.uniform(k_b, (1,), jnp.float32, -bound, bound)

    # ---- Case 1: small shape -> batch-blocked single-pass path ----
    B, T = 2, 8
    lstm_out = jax.random.normal(k_x, (B, T, H), dtype=jnp.float32)
    ctx, wts = attention_forward(lstm_out, attn_w, attn_b)
    jax.block_until_ready((ctx, wts))
    ref_ctx, ref_wts = _reference(lstm_out, attn_w, attn_b)
    assert jnp.allclose(ctx, ref_ctx, atol=1e-5, rtol=1e-4)
    assert jnp.allclose(wts, ref_wts, atol=1e-5, rtol=1e-4)

    # ---- Case 2: exercise the sequence-tiled online-softmax fallback ----
    # (tiny shape, but a small budget forces tt=128 -> 3 T-steps + masking)
    B2, T2 = 4, 320
    lstm_out2 = jax.random.normal(k_x2, (B2, T2, H), dtype=jnp.float32)
    ctx2, wts2 = attention_forward(lstm_out2, attn_w, attn_b,
                                   force_seq_tiling=True,
                                   slab_budget_bytes=300_000)
    jax.block_until_ready((ctx2, wts2))
    ref_ctx2, ref_wts2 = _reference(lstm_out2, attn_w, attn_b)
    assert jnp.allclose(ctx2, ref_ctx2, atol=2e-5, rtol=2e-4)
    assert jnp.allclose(wts2, ref_wts2, atol=2e-5, rtol=2e-4)

    print("KERNEL_OK")
</pallas_src>

<mosaic_0001>
module attributes {stable_mosaic.version = 11 : i64} {
  func.func @_attention_batch_kernel(%arg0: i32, %arg1: memref<2x8x32xf32, #tpu.memory_space<vmem>>, %arg2: memref<1x32xf32, #tpu.memory_space<vmem>>, %arg3: memref<1xf32, #tpu.memory_space<smem>>, %arg4: memref<2x32xf32, #tpu.memory_space<vmem>>, %arg5: memref<2x8xf32, #tpu.memory_space<vmem>>) attributes {dimension_semantics = [#tpu.dimension_semantics<parallel>], iteration_bounds = array<i64: 1>, scalar_prefetch = 0 : i64, scratch_operands = 0 : i64, tpu.core_type = #tpu.core_type<tc>, window_params = [{transform_indices = @transform_0, window_bounds = array<i64: 2, 8, 32>}, {pipeline_mode = #tpu.pipeline_mode<synchronous>, transform_indices = @transform_1, window_bounds = array<i64: 1, 32>}, {transform_indices = @transform_2, window_bounds = array<i64: 1>}, {transform_indices = @transform_3, window_bounds = array<i64: 2, 32>}, {transform_indices = @transform_4, window_bounds = array<i64: 2, 8>}]} {
    %c0 = arith.constant 0 : index
    %c0_0 = arith.constant 0 : index
    %c0_1 = arith.constant 0 : index
    %0 = vector.load %arg1[%c0, %c0_0, %c0_1] : memref<2x8x32xf32, #tpu.memory_space<vmem>>, vector<2x8x32xf32>
    %c0_2 = arith.constant 0 : index
    %c0_3 = arith.constant 0 : index
    %1 = vector.load %arg2[%c0_2, %c0_3] : memref<1x32xf32, #tpu.memory_space<vmem>>, vector<1x32xf32>
    %2 = vector.shape_cast %1 : vector<1x32xf32> to vector<1x1x32xf32>
    %3 = vector.broadcast %2 : vector<1x1x32xf32> to vector<2x8x32xf32>
    %4 = arith.mulf %0, %3 : vector<2x8x32xf32>
    %cst = arith.constant dense<0.000000e+00> : vector<2x8xf32>
    %5 = vector.multi_reduction <add>, %4, %cst [2] : vector<2x8x32xf32> to vector<2x8xf32>
    %c0_4 = arith.constant 0 : index
    %6 = memref.load %arg3[%c0_4] : memref<1xf32, #tpu.memory_space<smem>>
    %7 = vector.broadcast %6 : f32 to vector<2x8xf32>
    %8 = arith.addf %5, %7 : vector<2x8xf32>
    %cst_5 = arith.constant dense<0xFF800000> : vector<2xf32>
    %9 = vector.multi_reduction <maximumf>, %8, %cst_5 [1] : vector<2x8xf32> to vector<2xf32>
    %10 = vector.shape_cast %9 : vector<2xf32> to vector<2x1xf32>
    %11 = vector.broadcast %10 : vector<2x1xf32> to vector<2x8xf32>
    %12 = arith.subf %8, %11 : vector<2x8xf32>
    %13 = math.exp %12 : vector<2x8xf32>
    %cst_6 = arith.constant dense<0.000000e+00> : vector<2xf32>
    %14 = vector.multi_reduction <add>, %13, %cst_6 [1] : vector<2x8xf32> to vector<2xf32>
    %15 = vector.shape_cast %14 : vector<2xf32> to vector<2x1xf32>
    %16 = tpu.reciprocal %15 {approx = true} : vector<2x1xf32> -> vector<2x1xf32>
    %17 = arith.mulf %15, %16 : vector<2x1xf32>
    %cst_7 = arith.constant 2.000000e+00 : f32
    %18 = vector.broadcast %cst_7 : f32 to vector<2x1xf32>
    %19 = arith.subf %18, %17 : vector<2x1xf32>
    %20 = arith.mulf %16, %19 : vector<2x1xf32>
    %21 = vector.broadcast %20 : vector<2x1xf32> to vector<2x8xf32>
    %22 = arith.mulf %13, %21 : vector<2x8xf32>
    %c0_8 = arith.constant 0 : index
    %c0_9 = arith.constant 0 : index
    %23 = vector.load %arg5[%c0_8, %c0_9] : memref<2x8xf32, #tpu.memory_space<vmem>>, vector<2x8xf32>
    tpu.vector_store %arg5[%c0_8, %c0_9], %22 {strides = array<i32>} : memref<2x8xf32, #tpu.memory_space<vmem>>, vector<2x8xf32>,
    %24 = vector.shape_cast %22 : vector<2x8xf32> to vector<2x8x1xf32>
    %25 = vector.broadcast %24 : vector<2x8x1xf32> to vector<2x8x32xf32>
    %26 = arith.mulf %0, %25 : vector<2x8x32xf32>
    %cst_10 = arith.constant dense<0.000000e+00> : vector<2x32xf32>
    %27 = vector.multi_reduction <add>, %26, %cst_10 [1] : vector<2x8x32xf32> to vector<2x32xf32>
    %c0_11 = arith.constant 0 : index
    %c0_12 = arith.constant 0 : index
    %28 = vector.load %arg4[%c0_11, %c0_12] : memref<2x32xf32, #tpu.memory_space<vmem>>, vector<2x32xf32>
    tpu.vector_store %arg4[%c0_11, %c0_12], %27 {strides = array<i32>} : memref<2x32xf32, #tpu.memory_space<vmem>>, vector<2x32xf32>,
    return
  }
  func.func @transform_0(%arg0: i32) -> (i32, i32, i32) {
    %c0_i32 = arith.constant 0 : i32
    %c0_i32_0 = arith.constant 0 : i32
    %c0_i32_1 = arith.constant 0 : i32
    return %arg0, %c0_i32, %c0_i32_0 : i32, i32, i32
  }
  func.func @transform_1(%arg0: i32) -> (i32, i32) {
    %c0_i32 = arith.constant 0 : i32
    %c0_i32_0 = arith.constant 0 : i32
    %c0_i32_1 = arith.constant 0 : i32
    return %c0_i32, %c0_i32_0 : i32, i32
  }
  func.func @transform_2(%arg0: i32) -> i32 {
    %c0_i32 = arith.constant 0 : i32
    %c0_i32_0 = arith.constant 0 : i32
    return %c0_i32 : i32
  }
  func.func @transform_3(%arg0: i32) -> (i32, i32) {
    %c0_i32 = arith.constant 0 : i32
    %c0_i32_0 = arith.constant 0 : i32
    return %arg0, %c0_i32 : i32, i32
  }
  func.func @transform_4(%arg0: i32) -> (i32, i32) {
    %c0_i32 = arith.constant 0 : i32
    %c0_i32_0 = arith.constant 0 : i32
    return %arg0, %c0_i32 : i32, i32
  }
}

</mosaic_0001>

<bundles_post_ra>
// kernel: tpu_custom_call.1
= control target key start
LH: loop header
LB: loop body
LE: loop exit
PB: predicated region body
PF: predicated region fallthrough
CT: control target
= control target key end

     0   :  { %11 = vsyncpa [#allocation4], 0  ;;  %s329_s0 = inlined_call_operand.hbm [shape: f32[2,8,32], index: 0, kind: input, shape index: {}]   ;;  %s330_s1 = inlined_call_operand.vmem [shape: f32[1,32], index: 1, kind: input, shape index: {}]   ;;  %s331_s2 = inlined_call_operand.<no memory space> [shape: f32[1], index: 2, kind: input, shape index: {}]   ;;  %s332_s3 = inlined_call_operand.hbm [shape: f32[2,32], index: 3, kind: output, shape index: {0}]   ;;  %s333_s4 = inlined_call_operand.hbm [shape: f32[2,8], index: 4, kind: output, shape index: {1}]  }
   0x1   :  { %12 = vsyncpa [#allocation5], 0 }
   0x2   :  { %13 = vsyncpa [#allocation8], 0  ;;  %s18_s17 = sshll.u32 %s329_s0, 4  ;;  %s268_s18 = smov [#allocation3]   ;;  %s19_s17 = int_to_ptr.hbm [resolvable:$true] %s18_s17 }
   0x3   :  { %s20_s19 = sshll.u32 %s268_s18, 4  ;;  %s269_s20 = smov 128   ;;  %s21_s19 = int_to_ptr.vmem [resolvable:$true] %s20_s19 }
   0x4   :  { %s270_s21 = smov 8  }
   0x5   :  { %26 = dma.hbm_to_vmem [thread:$0]  %s19_s17, 256, %s21_s19, [#allocation4], %s269_s20, %s269_s20, %s270_s21  }
   0x6   :  { %262 = dma.done.wait [#allocation4], 256  }
   0x7   :  { %263 = vsyncadd [#allocation4], 4294967040  ;;  %v302_v0 = vld [vmem:[#allocation3] sm:$0xff]  ;;  %vm43_vm0 = vcmask 261120   ;;  %v36_v3 = vld [vmem:[#allocation3 + $0x8] sm:$0xff]  ;;  %v56_v8 = vlaneseq  ;;  %v51_v9 = vstv %s331_s2  ;;  %vm60_vm1 = vcmask 1041409  }
   0x8   :  { %v183_v1 = vld [vmem:[%s330_s1] ss:$0 sm:$0xff]  ;;  %vm63_vm2 = vcmask 58368   ;;  %v271_v18 = vmov 0   ;;  %s272_s1 = smov [#allocation7]   ;;  %s159_s27 = sshll.u32 %s333_s4, 4  ;;  %s160_s27 = int_to_ptr.hbm [resolvable:$true] %s159_s27 }
   0x9   :  { %v41_v2 = vmul.f32 %v183_v1, %v302_v0  ;;  %v42_v5 = vmul.f32 %v183_v1, %v36_v3  ;;  %v57_v10 = vand.u32 127, %v56_v8  ;;  %181 = vset.pattern.permute.xlu2 %v271_v18  ;;  %180 = vset.pattern.permute.xlu1 %v271_v18  ;;  %s157_s2 = sshll.u32 %s272_s1, 4  ;;  %s273_s4 = smov [#allocation6]   ;;  %vm139_vm3 = vcmask 254976   ;;  %s158_s2 = int_to_ptr.vmem [resolvable:$true] %s157_s2 }
   0xa   :  { %182 = vset.pattern.permute.xlu0 %v271_v18  ;;  %s146_s28 = sshll.u32 %s273_s4, 4  ;;  %s148_s5 = sshll.u32 %s332_s3, 4  ;;  %s147_s28 = int_to_ptr.vmem [resolvable:$true] %s146_s28  ;;  %s149_s5 = int_to_ptr.hbm [resolvable:$true] %s148_s5 }
   0xb   :  { %v44_v4 = vsel %vm43_vm0, %v41_v2, 0.0  ;;  %v47_v6 = vsel %vm43_vm0, %v42_v5, 0.0 }
   0xc   :  { %45 = vadd.xlane.f32.xlu0 %v44_v4 }
  0x14   :  { %48 = vadd.xlane.f32.xlu0 %v47_v6 }
  0x7f   :  { %v46_v7 = vpop.xlane.xlu0 %45 }
  0x80   :  { %v52_v11 = vadd.f32 %v51_v9, %v46_v7 }
  0x82   :  { %v58_v14 = vperm.slane %v52_v11, %v57_v10 }
  0x87   :  { %v49_v12 = vpop.xlane.xlu0 %48 }
  0x88   :  { %v53_v13 = vadd.f32 %v51_v9, %v49_v12 }
  0x8a   :  { %v59_v15 = vperm.slane %v53_v13, %v57_v10 }
  0x8c   :  { %v61_v16 = vsel %vm60_vm1, %v59_v15, %v58_v14 }
  0x8d   :  { %v64_v17 = vsel %vm63_vm2, %v61_v16, -inf }
  0x8e   :  { %65 = vmax.xlane.f32.xlu1 %v64_v17 }
 0x101   :  { %v66_v19 = vpop.xlane.xlu1 %65 }
 0x102   :  { %v68_v20 = vperm.slane %v66_v19, 0  ;;  %v69_v21 = vperm.slane %v66_v19, 1 }
 0x104   :  { %v72_v22 = vsub.f32 %v52_v11, %v68_v20  ;;  %v73_v23 = vsub.f32 %v53_v13, %v69_v21 }
 0x106   :  { %v74_v24 = vmul.f32 1.442695, %v72_v22  ;;  %v76_v25 = vmul.f32 1.442695, %v73_v23 }
 0x108   :  { %184 = vpow2.f32 %v74_v24 }
 0x109   :  { %186 = vpow2.f32 %v76_v25 }
 0x10e   :  { %v185_v26 = vpop.eup %184 }
 0x10f   :  { %v187_v27 = vpop.eup %186  ;;  %81 = vperm.xlu1 %180, %v185_v26  }
 0x110   :  { %84 = vperm.xlu2 %181, %v187_v27  }
 0x16a   :  { %v85_v28 = vpop.permute.xlu2 %84 }
 0x16b   :  { %v87_v30 = vperm.slane %v85_v28, %v57_v10 }
 0x181   :  { %v82_v29 = vpop.permute.xlu1 %81 }
 0x182   :  { %v86_v31 = vperm.slane %v82_v29, %v57_v10 }
 0x184   :  { %v88_v32 = vsel %vm60_vm1, %v87_v30, %v86_v31 }
 0x185   :  { %v90_v33 = vsel %vm63_vm2, %v88_v32, 0.0 }
 0x186   :  { %91 = vadd.xlane.f32.xlu2 %v90_v33 }
 0x1f9   :  { %v92_v34 = vpop.xlane.xlu2 %91 }
 0x1fa   :  { %188 = vrcp.f32 %v92_v34 }
 0x200   :  { %v189_v35 = vpop.eup %188 }
 0x201   :  { %v94_v36 = vmul.f32 %v189_v35, %v92_v34 }
 0x203   :  { %v95_v37 = vsub.f32 2.0, %v94_v36 }
 0x205   :  { %v96_v38 = vmul.f32 %v189_v35, %v95_v37 }
 0x207   :  { %v98_v39 = vperm.slane %v96_v38, 0  ;;  %v99_v40 = vperm.slane %v96_v38, 1 }
 0x209   :  { %v103_v41 = vmul.f32 %v187_v27, %v99_v40  ;;  %v102_v42 = vmul.f32 %v185_v26, %v98_v39 }
 0x20b   :  { %110 = vperm.xlu1 %180, %v103_v41   ;;  %107 = vperm.xlu0 %182, %v102_v42  }
 0x27d   :  { %v111_v43 = vpop.permute.xlu1 %110  ;;  %v108_v44 = vpop.permute.xlu0 %107 }
 0x27e   :  { %v113_v45 = vperm.slane %v111_v43, %v57_v10  ;;  %v120_v46 = vmul.f32 %v111_v43, %v36_v3  ;;  %v112_v47 = vperm.slane %v108_v44, %v57_v10  ;;  %v119_v48 = vmul.f32 %v108_v44, %v302_v0 }
 0x280   :  { %v128_v49 = vsel %vm43_vm0, %v120_v46, 0.0  ;;  %v114_v50 = vsel %vm60_vm1, %v113_v45, %v112_v47  ;;  %v121_v51 = vsel %vm43_vm0, %v119_v48, 0.0 }
 0x281   :  { %v129_v52 = vrot.slane %v128_v49, 4  ;;  %v122_v53 = vrot.slane %v121_v51, 4  ;;  %116 = vst.msk [vmem:[#allocation7] sm:$0x3] %vm63_vm2, %v114_v50 }
 0x282   :  { %162 = dma.vmem_to_hbm [thread:$0]  %s158_s2, 32, %s160_s27, [#allocation8]  }
 0x283   :  { %v130_v54 = vadd.f32 %v129_v52, %v128_v49  ;;  %v123_v55 = vadd.f32 %v122_v53, %v121_v51 }
 0x285   :  { %v131_v56 = vrot.slane %v130_v54, 2  ;;  %v124_v57 = vrot.slane %v123_v55, 2 }
 0x287   :  { %v132_v58 = vadd.f32 %v131_v56, %v130_v54  ;;  %v125_v59 = vadd.f32 %v124_v57, %v123_v55 }
 0x289   :  { %v133_v60 = vrot.slane %v132_v58, 1  ;;  %v126_v61 = vrot.slane %v125_v59, 1 }
 0x28b   :  { %v134_v62 = vadd.f32 %v133_v60, %v132_v58  ;;  %v127_v63 = vadd.f32 %v126_v61, %v125_v59 }
 0x28d   :  { %v137_v0 = vsel %vm60_vm1, %v134_v62, %v127_v63 }
 0x28e   :  { %140 = vst.msk [vmem:[#allocation6] sm:$0x3] %vm139_vm3, %v137_v0 }
 0x28f   :  { %151 = dma.vmem_to_hbm [thread:$0]  %s147_s28, 32, %s149_s5, [#allocation5]  }
 0x290   :  { %264 = dma.done.wait [#allocation5], 32  }
 0x291   :  { %265 = vsyncadd [#allocation5], 4294967264 }
 0x292   :  { %266 = dma.done.wait [#allocation8], 32  }
 0x293   :  { %267 = vsyncadd [#allocation8], 4294967264 }
 0x294   :  { %171 = vsyncpa [#allocation4], 1 }
 0x295   :  { %172 = vsyncpa [#allocation5], 1 }
 0x296   :  { %173 = vsyncpa [#allocation8], 1 }

</bundles_post_ra>
